<compile_context>
chip_gen: v6e
topology: v6e:2x2x1
jax: 0.10.0
libtpu: 0.0.40
codegen_flags: <defaults>
</compile_context>

<pallas_src>
import functools

import jax
import jax.numpy as jnp
from jax.experimental import pallas as pl
from jax.experimental.pallas import tpu as pltpu


def _cdiv(a, b):
    return -(-a // b)


def _round_up(a, m):
    return _cdiv(a, m) * m


def _dice_sums_kernel(x_ref, y_ref, inter_ref, spred_ref, sgt_ref,
                      acc_i, acc_p, acc_g, *, num_classes: int,
                      apply_softmax: bool, has_pad: bool, softmax_dtype):
    """Grid = (B * n_split, spatial_steps).

    Blocks:
      x_ref : (1, C, rows, 128) logits (native dtype, widened on the tile)
      y_ref : (1, 1, rows, 128) integer labels (padded pixels carry sentinel C)
      out   : (1, C, 128)       per-(sample-split, class) partial sums
      acc_* : (C, 8, 128) f32   narrow accumulators; each step's tile is folded
                                to one (8,128) vreg per class/quantity before
                                touching them (no wide acc load/store traffic).
    """
    C = num_classes
    s = pl.program_id(1)

    @pl.when(s == 0)
    def _():
        # Narrow accumulators -> this zero-fill is a few KiB, negligible.
        acc_i[...] = jnp.zeros_like(acc_i)
        acc_p[...] = jnp.zeros_like(acc_p)
        acc_g[...] = jnp.zeros_like(acc_g)

    rows = x_ref.shape[2]
    groups = rows // 8

    def fold8(v):
        # (rows, 128) -> (8, 128): layout-preserving sublane-group tree sum.
        # Pure VALU adds across vregs; no XLU, no wide-accumulator stores.
        return jnp.sum(v.reshape(groups, 8, 128), axis=0)

    labels = y_ref[0, 0].astype(jnp.int32)

    if apply_softmax:
        # Fused softmax: keep only es[c], m, den live (~C+3 full-tile temps).
        xs = lambda c: x_ref[0, c].astype(softmax_dtype)
        m = xs(0)
        for c in range(1, C):
            m = jnp.maximum(m, xs(c))
        es = [jnp.exp(xs(c) - m).astype(jnp.float32) for c in range(C)]
        den = es[0]
        for c in range(1, C):
            den = den + es[c]
        # EUP vrcp + one Newton step: ~f32-exact at 2 extra VALU ops.
        inv = pl.reciprocal(den, approx=True)
        inv = inv * (2.0 - den * inv)
    else:
        es = [x_ref[0, c].astype(jnp.float32) for c in range(C)]
        inv = None

    if has_pad:
        valid = labels < C        # padded pixels carry the sentinel label C

    for c in range(C):
        p_c = es[c] * inv if inv is not None else es[c]
        if has_pad:
            # Drop padded pixels from sum_pred; their sentinel label already
            # keeps them out of intersect / sum_gt.  (Out-of-range real labels
            # are likewise dropped here - torch's scatter_ would error anyway.)
            p_c = jnp.where(valid, p_c, 0.0)
        hit = labels == c                         # on-the-fly one-hot (bool)
        acc_p[c] += fold8(p_c)
        acc_i[c] += fold8(jnp.where(hit, p_c, 0.0))
        acc_g[c] += fold8(hit.astype(jnp.float32))

    @pl.when(s == pl.num_programs(1) - 1)
    def _():
        # Single cross-sublane (XLU) reduce per quantity, only in the epilogue.
        inter_ref[0] = jnp.sum(acc_i[...], axis=1)
        spred_ref[0] = jnp.sum(acc_p[...], axis=1)
        sgt_ref[0] = jnp.sum(acc_g[...], axis=1)


def _pick_tiling(num_rows, C, x_bytes, y_bytes, batch):
    """Choose (n_split, tile_rows, n_steps, vmem_limit); rows = 128-lane groups."""
    try:
        phys = pltpu.get_tpu_info().vmem_capacity_bytes   # 128 MiB v5e/v6e, 64 MiB v7x
    except Exception:
        phys = 64 << 20                                   # assume the smallest (v7x)
    budget = min(phys // 4, 32 << 20)

    # 2-way spatial split whenever B is odd (incl. B == 1) so both v7x
    # TensorCores always get balanced work; padding makes it always legal.
    n_split = 2 if batch % 2 == 1 else 1
    rows_needed = _cdiv(num_rows, n_split)

    # Sublane alignment so bf16 x / int8-int16 labels stay cleanly packed.
    align = max(8, 32 // x_bytes, 32 // y_bytes)

    # VMEM per spatial row: double-buffered x+y blocks + ~(C+6) f32 softmax /
    # select temporaries.  Narrow (C,8,128) accumulators are negligible.
    per_row = 128 * (2 * (C * x_bytes + y_bytes) + (C + 6) * 4)
    cap = max(align, (budget // per_row) // align * align)

    # >=512 rows already sits at the HBM roofline; bigger tiles only expose the
    # first-block DMA and eat VMEM, so cap at 1024 and aim for >=4 steps/sample.
    tile_rows = min(cap, 1024)
    tile_rows = min(tile_rows, _round_up(_cdiv(rows_needed, 4), align))
    tile_rows = min(tile_rows, _round_up(rows_needed, align))
    tile_rows = max(align, (tile_rows // align) * align)
    n_steps = _cdiv(rows_needed, tile_rows)

    block_bytes = 2 * (C * x_bytes + y_bytes) * tile_rows * 128
    temp_bytes = (C + 8) * tile_rows * 128 * 4
    scratch_bytes = 3 * C * 8 * 128 * 4
    vmem_limit = block_bytes + temp_bytes + scratch_bytes + (4 << 20)
    vmem_limit = int(min(max(vmem_limit, 16 << 20), phys - (8 << 20)))
    return n_split, tile_rows, n_steps, vmem_limit


def _dice_sums(x_flat, y_flat, *, apply_softmax: bool, bf16_softmax: bool):
    """x_flat: (B, C, S) logits (native dtype); y_flat: (B, S) integer labels.

    Returns intersect, sum_pred, sum_gt, each (B, C) float32.
    """
    B, C, S = x_flat.shape
    NL = _cdiv(S, 128)
    n_split, tile_rows, n_steps, vmem_limit = _pick_tiling(
        NL, C, x_flat.dtype.itemsize, y_flat.dtype.itemsize, B)

    NL_pad = n_split * n_steps * tile_rows
    S_pad = NL_pad * 128
    has_pad = S_pad != S
    if has_pad:
        # Padded labels get the out-of-range sentinel C (never match a class);
        # padded probabilities are masked out of sum_pred inside the kernel.
        x_flat = jnp.pad(x_flat, ((0, 0), (0, 0), (0, S_pad - S)))
        y_flat = jnp.pad(y_flat, ((0, 0), (0, S_pad - S)), constant_values=C)
    x_r = x_flat.reshape(B, C, NL_pad, 128)
    y_r = y_flat.reshape(B, 1, NL_pad, 128)

    G = B * n_split
    if n_split == 1:
        def in_map(p, s):
            return (p, 0, s, 0)
    else:
        def in_map(p, s):
            return (p // n_split, 0, (p % n_split) * n_steps + s, 0)

    out_map = lambda p, s: (p, 0, 0)
    out_sds = jax.ShapeDtypeStruct((G, C, 128), jnp.float32)

    softmax_dtype = (jnp.bfloat16
                     if (bf16_softmax and x_r.dtype == jnp.bfloat16)
                     else jnp.float32)
    kernel = functools.partial(
        _dice_sums_kernel, num_classes=C, apply_softmax=apply_softmax,
        has_pad=has_pad, softmax_dtype=softmax_dtype)

    grid_spec = pltpu.PrefetchScalarGridSpec(
        num_scalar_prefetch=0,
        grid=(G, n_steps),
        in_specs=[
            pl.BlockSpec((1, C, tile_rows, 128), in_map),
            pl.BlockSpec((1, 1, tile_rows, 128), in_map),
        ],
        out_specs=[pl.BlockSpec((1, C, 128), out_map) for _ in range(3)],
        scratch_shapes=[pltpu.VMEM((C, 8, 128), jnp.float32)
                        for _ in range(3)],
    )

    n_px = B * NL_pad * 128
    cost = pl.CostEstimate(
        flops=12 * C * n_px,
        transcendentals=(C * n_px) if apply_softmax else 0,
        bytes_accessed=int(x_r.size * x_r.dtype.itemsize
                           + y_r.size * y_r.dtype.itemsize
                           + 3 * G * C * 128 * 4),
    )

    i_out, p_out, g_out = pl.pallas_call(
        kernel,
        out_shape=(out_sds, out_sds, out_sds),
        grid_spec=grid_spec,
        compiler_params=pltpu.CompilerParams(
            dimension_semantics=("parallel", "arbitrary"),
            vmem_limit_bytes=vmem_limit),
        cost_estimate=cost,
    )(x_r, y_r)

    def fold(t):   # (G, C, 128) -> (B, C): fold lanes, then spatial splits
        return t.sum(-1).reshape(B, n_split, C).sum(1)

    return fold(i_out), fold(p_out), fold(g_out)


def memory_efficient_soft_dice_loss(x, y, *, smooth: float = 1.0,
                                    apply_softmax: bool = True,
                                    batch_dice: bool = False,
                                    do_bg: bool = True,
                                    bf16_softmax: bool = False):
    """Forward of nnUNetv2 MemoryEfficientSoftDiceLoss.

    x: (B, C, *spatial) logits (any float dtype; kept native to minimize HBM
    traffic).  y: (B, *spatial) or (B, 1, *spatial) integer label map.
    Matches apply_nonlin=softmax(dim=1), loss_mask=None, single-device.
    bf16_softmax=True runs max/sub/exp in bf16 for bf16 inputs (v6e/v7x EUP
    relief); off by default to keep the softmax f32-exact.
    """
    B, C = x.shape[0], x.shape[1]
    S = 1
    for d in x.shape[2:]:
        S *= d

    if y.ndim == x.ndim:
        # TODO(synk): already-one-hot targets (y.shape == x.shape) not supported.
        assert y.shape[1] == 1, "expected a label map, not one-hot targets"
        y = y.reshape(y.shape[0], *y.shape[2:])
    y_flat = y.reshape(B, S)
    x_flat = x.reshape(B, C, S)

    # Labels are a big share of HBM traffic: keep narrow native ints; widen only
    # int64 / non-integer dtypes / dtypes that cannot hold the pad sentinel C.
    if not jnp.issubdtype(y_flat.dtype, jnp.integer):
        y_flat = y_flat.astype(jnp.int32)
    elif y_flat.dtype.itemsize > 4 or jnp.iinfo(y_flat.dtype).max < C:
        y_flat = y_flat.astype(jnp.int32)

    intersect, sum_pred, sum_gt = _dice_sums(
        x_flat, y_flat, apply_softmax=apply_softmax, bf16_softmax=bf16_softmax)

    if not do_bg:
        intersect, sum_pred, sum_gt = (intersect[:, 1:], sum_pred[:, 1:],
                                       sum_gt[:, 1:])
    if batch_dice:
        # TODO(synk): ddp AllGatherGrad (cross-device all-gather) not implemented.
        intersect, sum_pred, sum_gt = (intersect.sum(0), sum_pred.sum(0),
                                       sum_gt.sum(0))

    dc = (2.0 * intersect + smooth) / jnp.clip(sum_gt + sum_pred + smooth, 1e-8)
    return -dc.mean()


def _reference_loss(x, y, *, smooth: float = 1.0, apply_softmax: bool = True):
    p = jax.nn.softmax(x.astype(jnp.float32), axis=1) if apply_softmax \
        else x.astype(jnp.float32)
    y1h = jax.nn.one_hot(y, x.shape[1], axis=1, dtype=jnp.float32)
    axes = tuple(range(2, x.ndim))
    intersect = (p * y1h).sum(axes)
    sum_pred = p.sum(axes)
    sum_gt = y1h.sum(axes)
    dc = (2.0 * intersect + smooth) / jnp.clip(sum_gt + sum_pred + smooth, 1e-8)
    return -dc.mean()


if __name__ == "__main__":
    key = jax.random.PRNGKey(0)
    kx, ky, kx2, ky2 = jax.random.split(key, 4)

    # Case 1: B=2 (even -> no spatial split), C=4, 16x16 spatial.
    B, C, H, W = 2, 4, 16, 16
    x = jax.random.normal(kx, (B, C, H, W), dtype=jnp.float32)
    y = jax.random.randint(ky, (B, H, W), 0, C, dtype=jnp.int32)
    loss = jax.block_until_ready(jax.jit(memory_efficient_soft_dice_loss)(x, y))
    ref = _reference_loss(x, y)
    assert jnp.allclose(loss, ref, atol=2e-5, rtol=2e-5), (loss, ref)

    # Case 2: B=1 (odd -> forced 2-way split), 3D spatial not a multiple of 128
    # -> exercises the pad-with-sentinel + in-kernel masking path.
    x2 = jax.random.normal(kx2, (1, 3, 4, 8, 9), dtype=jnp.float32)
    y2 = jax.random.randint(ky2, (1, 4, 8, 9), 0, 3, dtype=jnp.int32)
    loss2 = jax.block_until_ready(jax.jit(memory_efficient_soft_dice_loss)(x2, y2))
    ref2 = _reference_loss(x2, y2)
    assert jnp.allclose(loss2, ref2, atol=2e-5, rtol=2e-5), (loss2, ref2)

    print("KERNEL_OK")
</pallas_src>

<mosaic_0001>
module attributes {stable_mosaic.version = 11 : i64} {
  func.func @_dice_sums_kernel(%arg0: i32, %arg1: i32, %arg2: memref<1x4x8x128xf32, #tpu.memory_space<vmem>>, %arg3: memref<1x1x8x128xi32, #tpu.memory_space<vmem>>, %arg4: memref<1x4x128xf32, #tpu.memory_space<vmem>>, %arg5: memref<1x4x128xf32, #tpu.memory_space<vmem>>, %arg6: memref<1x4x128xf32, #tpu.memory_space<vmem>>, %arg7: memref<4x8x128xf32, #tpu.memory_space<vmem>>, %arg8: memref<4x8x128xf32, #tpu.memory_space<vmem>>, %arg9: memref<4x8x128xf32, #tpu.memory_space<vmem>>) attributes {dimension_semantics = [#tpu.dimension_semantics<parallel>, #tpu.dimension_semantics<arbitrary>], iteration_bounds = array<i64: 2, 1>, scalar_prefetch = 0 : i64, scratch_operands = 3 : i64, tpu.core_type = #tpu.core_type<tc>, window_params = [{transform_indices = @transform_0, window_bounds = array<i64: 1, 4, 8, 128>}, {transform_indices = @transform_1, window_bounds = array<i64: 1, 1, 8, 128>}, {transform_indices = @transform_2, window_bounds = array<i64: 1, 4, 128>}, {transform_indices = @transform_3, window_bounds = array<i64: 1, 4, 128>}, {transform_indices = @transform_4, window_bounds = array<i64: 1, 4, 128>}]} {
    %c0_i32 = arith.constant 0 : i32
    %0 = arith.cmpi eq, %arg1, %c0_i32 : i32
    %1 = arith.extui %0 : i1 to i32
    %c0_i32_0 = arith.constant 0 : i32
    %2 = arith.cmpi ne, %1, %c0_i32_0 : i32
    scf.if %2 {
      %cst_128 = arith.constant 0.000000e+00 : f32
      %177 = vector.broadcast %cst_128 : f32 to vector<4x8x128xf32>
      %c0_129 = arith.constant 0 : index
      %c0_130 = arith.constant 0 : index
      %c0_131 = arith.constant 0 : index
      %178 = vector.load %arg7[%c0_129, %c0_130, %c0_131] : memref<4x8x128xf32, #tpu.memory_space<vmem>>, vector<4x8x128xf32>
      tpu.vector_store %arg7[%c0_129, %c0_130, %c0_131], %177 {strides = array<i32>} : memref<4x8x128xf32, #tpu.memory_space<vmem>>, vector<4x8x128xf32>,
      %cst_132 = arith.constant 0.000000e+00 : f32
      %179 = vector.broadcast %cst_132 : f32 to vector<4x8x128xf32>
      %c0_133 = arith.constant 0 : index
      %c0_134 = arith.constant 0 : index
      %c0_135 = arith.constant 0 : index
      %180 = vector.load %arg8[%c0_133, %c0_134, %c0_135] : memref<4x8x128xf32, #tpu.memory_space<vmem>>, vector<4x8x128xf32>
      tpu.vector_store %arg8[%c0_133, %c0_134, %c0_135], %179 {strides = array<i32>} : memref<4x8x128xf32, #tpu.memory_space<vmem>>, vector<4x8x128xf32>,
      %cst_136 = arith.constant 0.000000e+00 : f32
      %181 = vector.broadcast %cst_136 : f32 to vector<4x8x128xf32>
      %c0_137 = arith.constant 0 : index
      %c0_138 = arith.constant 0 : index
      %c0_139 = arith.constant 0 : index
      %182 = vector.load %arg9[%c0_137, %c0_138, %c0_139] : memref<4x8x128xf32, #tpu.memory_space<vmem>>, vector<4x8x128xf32>
      tpu.vector_store %arg9[%c0_137, %c0_138, %c0_139], %181 {strides = array<i32>} : memref<4x8x128xf32, #tpu.memory_space<vmem>>, vector<4x8x128xf32>,
    } else {
    }
    %c0 = arith.constant 0 : index
    %c0_1 = arith.constant 0 : index
    %c0_2 = arith.constant 0 : index
    %c0_3 = arith.constant 0 : index
    %3 = vector.load %arg3[%c0, %c0_1, %c0_2, %c0_3] : memref<1x1x8x128xi32, #tpu.memory_space<vmem>>, vector<1x1x8x128xi32>
    %4 = vector.shape_cast %3 : vector<1x1x8x128xi32> to vector<8x128xi32>
    %c0_4 = arith.constant 0 : index
    %c0_5 = arith.constant 0 : index
    %c0_6 = arith.constant 0 : index
    %c0_7 = arith.constant 0 : index
    %5 = vector.load %arg2[%c0_4, %c0_5, %c0_6, %c0_7] : memref<1x4x8x128xf32, #tpu.memory_space<vmem>>, vector<1x1x8x128xf32>
    %6 = vector.shape_cast %5 : vector<1x1x8x128xf32> to vector<8x128xf32>
    %c0_8 = arith.constant 0 : index
    %c1 = arith.constant 1 : index
    %c0_9 = arith.constant 0 : index
    %c0_10 = arith.constant 0 : index
    %7 = vector.load %arg2[%c0_8, %c1, %c0_9, %c0_10] : memref<1x4x8x128xf32, #tpu.memory_space<vmem>>, vector<1x1x8x128xf32>
    %8 = vector.shape_cast %7 : vector<1x1x8x128xf32> to vector<8x128xf32>
    %9 = arith.maximumf %6, %8 : vector<8x128xf32>
    %c0_11 = arith.constant 0 : index
    %c2 = arith.constant 2 : index
    %c0_12 = arith.constant 0 : index
    %c0_13 = arith.constant 0 : index
    %10 = vector.load %arg2[%c0_11, %c2, %c0_12, %c0_13] : memref<1x4x8x128xf32, #tpu.memory_space<vmem>>, vector<1x1x8x128xf32>
    %11 = vector.shape_cast %10 : vector<1x1x8x128xf32> to vector<8x128xf32>
    %12 = arith.maximumf %9, %11 : vector<8x128xf32>
    %c0_14 = arith.constant 0 : index
    %c3 = arith.constant 3 : index
    %c0_15 = arith.constant 0 : index
    %c0_16 = arith.constant 0 : index
    %13 = vector.load %arg2[%c0_14, %c3, %c0_15, %c0_16] : memref<1x4x8x128xf32, #tpu.memory_space<vmem>>, vector<1x1x8x128xf32>
    %14 = vector.shape_cast %13 : vector<1x1x8x128xf32> to vector<8x128xf32>
    %15 = arith.maximumf %12, %14 : vector<8x128xf32>
    %c0_17 = arith.constant 0 : index
    %c0_18 = arith.constant 0 : index
    %c0_19 = arith.constant 0 : index
    %c0_20 = arith.constant 0 : index
    %16 = vector.load %arg2[%c0_17, %c0_18, %c0_19, %c0_20] : memref<1x4x8x128xf32, #tpu.memory_space<vmem>>, vector<1x1x8x128xf32>
    %17 = vector.shape_cast %16 : vector<1x1x8x128xf32> to vector<8x128xf32>
    %18 = arith.subf %17, %15 : vector<8x128xf32>
    %19 = math.exp %18 : vector<8x128xf32>
    %c0_21 = arith.constant 0 : index
    %c1_22 = arith.constant 1 : index
    %c0_23 = arith.constant 0 : index
    %c0_24 = arith.constant 0 : index
    %20 = vector.load %arg2[%c0_21, %c1_22, %c0_23, %c0_24] : memref<1x4x8x128xf32, #tpu.memory_space<vmem>>, vector<1x1x8x128xf32>
    %21 = vector.shape_cast %20 : vector<1x1x8x128xf32> to vector<8x128xf32>
    %22 = arith.subf %21, %15 : vector<8x128xf32>
    %23 = math.exp %22 : vector<8x128xf32>
    %c0_25 = arith.constant 0 : index
    %c2_26 = arith.constant 2 : index
    %c0_27 = arith.constant 0 : index
    %c0_28 = arith.constant 0 : index
    %24 = vector.load %arg2[%c0_25, %c2_26, %c0_27, %c0_28] : memref<1x4x8x128xf32, #tpu.memory_space<vmem>>, vector<1x1x8x128xf32>
    %25 = vector.shape_cast %24 : vector<1x1x8x128xf32> to vector<8x128xf32>
    %26 = arith.subf %25, %15 : vector<8x128xf32>
    %27 = math.exp %26 : vector<8x128xf32>
    %c0_29 = arith.constant 0 : index
    %c3_30 = arith.constant 3 : index
    %c0_31 = arith.constant 0 : index
    %c0_32 = arith.constant 0 : index
    %28 = vector.load %arg2[%c0_29, %c3_30, %c0_31, %c0_32] : memref<1x4x8x128xf32, #tpu.memory_space<vmem>>, vector<1x1x8x128xf32>
    %29 = vector.shape_cast %28 : vector<1x1x8x128xf32> to vector<8x128xf32>
    %30 = arith.subf %29, %15 : vector<8x128xf32>
    %31 = math.exp %30 : vector<8x128xf32>
    %32 = arith.addf %19, %23 : vector<8x128xf32>
    %33 = arith.addf %32, %27 : vector<8x128xf32>
    %34 = arith.addf %33, %31 : vector<8x128xf32>
    %35 = tpu.reciprocal %34 {approx = true} : vector<8x128xf32> -> vector<8x128xf32>
    %36 = arith.mulf %34, %35 : vector<8x128xf32>
    %cst = arith.constant 2.000000e+00 : f32
    %37 = vector.broadcast %cst : f32 to vector<8x128xf32>
    %38 = arith.subf %37, %36 : vector<8x128xf32>
    %39 = arith.mulf %35, %38 : vector<8x128xf32>
    %c4_i32 = arith.constant 4 : i32
    %40 = vector.broadcast %c4_i32 : i32 to vector<8x128xi32>
    %41 = arith.cmpi slt, %4, %40 : vector<8x128xi32>
    %42 = arith.mulf %19, %39 : vector<8x128xf32>
    %cst_33 = arith.constant 0.000000e+00 : f32
    %43 = vector.broadcast %cst_33 : f32 to vector<8x128xf32>
    %44 = arith.select %41, %42, %43 : vector<8x128xi1>, vector<8x128xf32>
    %c0_i32_34 = arith.constant 0 : i32
    %45 = vector.broadcast %c0_i32_34 : i32 to vector<8x128xi32>
    %46 = arith.cmpi eq, %4, %45 : vector<8x128xi32>
    %c0_35 = arith.constant 0 : index
    %c0_36 = arith.constant 0 : index
    %c0_37 = arith.constant 0 : index
    %47 = vector.load %arg8[%c0_35, %c0_36, %c0_37] : memref<4x8x128xf32, #tpu.memory_space<vmem>>, vector<1x8x128xf32>
    %48 = vector.shape_cast %47 : vector<1x8x128xf32> to vector<8x128xf32>
    %49 = vector.shape_cast %44 : vector<8x128xf32> to vector<1x8x128xf32>
    %cst_38 = arith.constant dense<0.000000e+00> : vector<8x128xf32>
    %50 = vector.multi_reduction <add>, %49, %cst_38 [0] : vector<1x8x128xf32> to vector<8x128xf32>
    %51 = arith.addf %48, %50 : vector<8x128xf32>
    %c0_39 = arith.constant 0 : index
    %c0_40 = arith.constant 0 : index
    %c0_41 = arith.constant 0 : index
    %52 = vector.load %arg8[%c0_39, %c0_40, %c0_41] : memref<4x8x128xf32, #tpu.memory_space<vmem>>, vector<1x8x128xf32>
    %53 = vector.shape_cast %52 : vector<1x8x128xf32> to vector<8x128xf32>
    %54 = vector.shape_cast %51 : vector<8x128xf32> to vector<1x8x128xf32>
    tpu.vector_store %arg8[%c0_39, %c0_40, %c0_41], %54 {strides = array<i32>} : memref<4x8x128xf32, #tpu.memory_space<vmem>>, vector<1x8x128xf32>,
    %c0_42 = arith.constant 0 : index
    %c0_43 = arith.constant 0 : index
    %c0_44 = arith.constant 0 : index
    %55 = vector.load %arg7[%c0_42, %c0_43, %c0_44] : memref<4x8x128xf32, #tpu.memory_space<vmem>>, vector<1x8x128xf32>
    %56 = vector.shape_cast %55 : vector<1x8x128xf32> to vector<8x128xf32>
    %cst_45 = arith.constant 0.000000e+00 : f32
    %57 = vector.broadcast %cst_45 : f32 to vector<8x128xf32>
    %58 = arith.select %46, %44, %57 : vector<8x128xi1>, vector<8x128xf32>
    %59 = vector.shape_cast %58 : vector<8x128xf32> to vector<1x8x128xf32>
    %cst_46 = arith.constant dense<0.000000e+00> : vector<8x128xf32>
    %60 = vector.multi_reduction <add>, %59, %cst_46 [0] : vector<1x8x128xf32> to vector<8x128xf32>
    %61 = arith.addf %56, %60 : vector<8x128xf32>
    %c0_47 = arith.constant 0 : index
    %c0_48 = arith.constant 0 : index
    %c0_49 = arith.constant 0 : index
    %62 = vector.load %arg7[%c0_47, %c0_48, %c0_49] : memref<4x8x128xf32, #tpu.memory_space<vmem>>, vector<1x8x128xf32>
    %63 = vector.shape_cast %62 : vector<1x8x128xf32> to vector<8x128xf32>
    %64 = vector.shape_cast %61 : vector<8x128xf32> to vector<1x8x128xf32>
    tpu.vector_store %arg7[%c0_47, %c0_48, %c0_49], %64 {strides = array<i32>} : memref<4x8x128xf32, #tpu.memory_space<vmem>>, vector<1x8x128xf32>,
    %c0_50 = arith.constant 0 : index
    %c0_51 = arith.constant 0 : index
    %c0_52 = arith.constant 0 : index
    %65 = vector.load %arg9[%c0_50, %c0_51, %c0_52] : memref<4x8x128xf32, #tpu.memory_space<vmem>>, vector<1x8x128xf32>
    %66 = vector.shape_cast %65 : vector<1x8x128xf32> to vector<8x128xf32>
    %67 = arith.extui %46 : vector<8x128xi1> to vector<8x128xi32>
    %68 = arith.sitofp %67 : vector<8x128xi32> to vector<8x128xf32>
    %69 = vector.shape_cast %68 : vector<8x128xf32> to vector<1x8x128xf32>
    %cst_53 = arith.constant dense<0.000000e+00> : vector<8x128xf32>
    %70 = vector.multi_reduction <add>, %69, %cst_53 [0] : vector<1x8x128xf32> to vector<8x128xf32>
    %71 = arith.addf %66, %70 : vector<8x128xf32>
    %c0_54 = arith.constant 0 : index
    %c0_55 = arith.constant 0 : index
    %c0_56 = arith.constant 0 : index
    %72 = vector.load %arg9[%c0_54, %c0_55, %c0_56] : memref<4x8x128xf32, #tpu.memory_space<vmem>>, vector<1x8x128xf32>
    %73 = vector.shape_cast %72 : vector<1x8x128xf32> to vector<8x128xf32>
    %74 = vector.shape_cast %71 : vector<8x128xf32> to vector<1x8x128xf32>
    tpu.vector_store %arg9[%c0_54, %c0_55, %c0_56], %74 {strides = array<i32>} : memref<4x8x128xf32, #tpu.memory_space<vmem>>, vector<1x8x128xf32>,
    %75 = arith.mulf %23, %39 : vector<8x128xf32>
    %cst_57 = arith.constant 0.000000e+00 : f32
    %76 = vector.broadcast %cst_57 : f32 to vector<8x128xf32>
    %77 = arith.select %41, %75, %76 : vector<8x128xi1>, vector<8x128xf32>
    %c1_i32 = arith.constant 1 : i32
    %78 = vector.broadcast %c1_i32 : i32 to vector<8x128xi32>
    %79 = arith.cmpi eq, %4, %78 : vector<8x128xi32>
    %c1_58 = arith.constant 1 : index
    %c0_59 = arith.constant 0 : index
    %c0_60 = arith.constant 0 : index
    %80 = vector.load %arg8[%c1_58, %c0_59, %c0_60] : memref<4x8x128xf32, #tpu.memory_space<vmem>>, vector<1x8x128xf32>
    %81 = vector.shape_cast %80 : vector<1x8x128xf32> to vector<8x128xf32>
    %82 = vector.shape_cast %77 : vector<8x128xf32> to vector<1x8x128xf32>
    %cst_61 = arith.constant dense<0.000000e+00> : vector<8x128xf32>
    %83 = vector.multi_reduction <add>, %82, %cst_61 [0] : vector<1x8x128xf32> to vector<8x128xf32>
    %84 = arith.addf %81, %83 : vector<8x128xf32>
    %c1_62 = arith.constant 1 : index
    %c0_63 = arith.constant 0 : index
    %c0_64 = arith.constant 0 : index
    %85 = vector.load %arg8[%c1_62, %c0_63, %c0_64] : memref<4x8x128xf32, #tpu.memory_space<vmem>>, vector<1x8x128xf32>
    %86 = vector.shape_cast %85 : vector<1x8x128xf32> to vector<8x128xf32>
    %87 = vector.shape_cast %84 : vector<8x128xf32> to vector<1x8x128xf32>
    tpu.vector_store %arg8[%c1_62, %c0_63, %c0_64], %87 {strides = array<i32>} : memref<4x8x128xf32, #tpu.memory_space<vmem>>, vector<1x8x128xf32>,
    %c1_65 = arith.constant 1 : index
    %c0_66 = arith.constant 0 : index
    %c0_67 = arith.constant 0 : index
    %88 = vector.load %arg7[%c1_65, %c0_66, %c0_67] : memref<4x8x128xf32, #tpu.memory_space<vmem>>, vector<1x8x128xf32>
    %89 = vector.shape_cast %88 : vector<1x8x128xf32> to vector<8x128xf32>
    %cst_68 = arith.constant 0.000000e+00 : f32
    %90 = vector.broadcast %cst_68 : f32 to vector<8x128xf32>
    %91 = arith.select %79, %77, %90 : vector<8x128xi1>, vector<8x128xf32>
    %92 = vector.shape_cast %91 : vector<8x128xf32> to vector<1x8x128xf32>
    %cst_69 = arith.constant dense<0.000000e+00> : vector<8x128xf32>
    %93 = vector.multi_reduction <add>, %92, %cst_69 [0] : vector<1x8x128xf32> to vector<8x128xf32>
    %94 = arith.addf %89, %93 : vector<8x128xf32>
    %c1_70 = arith.constant 1 : index
    %c0_71 = arith.constant 0 : index
    %c0_72 = arith.constant 0 : index
    %95 = vector.load %arg7[%c1_70, %c0_71, %c0_72] : memref<4x8x128xf32, #tpu.memory_space<vmem>>, vector<1x8x128xf32>
    %96 = vector.shape_cast %95 : vector<1x8x128xf32> to vector<8x128xf32>
    %97 = vector.shape_cast %94 : vector<8x128xf32> to vector<1x8x128xf32>
    tpu.vector_store %arg7[%c1_70, %c0_71, %c0_72], %97 {strides = array<i32>} : memref<4x8x128xf32, #tpu.memory_space<vmem>>, vector<1x8x128xf32>,
    %c1_73 = arith.constant 1 : index
    %c0_74 = arith.constant 0 : index
    %c0_75 = arith.constant 0 : index
    %98 = vector.load %arg9[%c1_73, %c0_74, %c0_75] : memref<4x8x128xf32, #tpu.memory_space<vmem>>, vector<1x8x128xf32>
    %99 = vector.shape_cast %98 : vector<1x8x128xf32> to vector<8x128xf32>
    %100 = arith.extui %79 : vector<8x128xi1> to vector<8x128xi32>
    %101 = arith.sitofp %100 : vector<8x128xi32> to vector<8x128xf32>
    %102 = vector.shape_cast %101 : vector<8x128xf32> to vector<1x8x128xf32>
    %cst_76 = arith.constant dense<0.000000e+00> : vector<8x128xf32>
    %103 = vector.multi_reduction <add>, %102, %cst_76 [0] : vector<1x8x128xf32> to vector<8x128xf32>
    %104 = arith.addf %99, %103 : vector<8x128xf32>
    %c1_77 = arith.constant 1 : index
    %c0_78 = arith.constant 0 : index
    %c0_79 = arith.constant 0 : index
    %105 = vector.load %arg9[%c1_77, %c0_78, %c0_79] : memref<4x8x128xf32, #tpu.memory_space<vmem>>, vector<1x8x128xf32>
    %106 = vector.shape_cast %105 : vector<1x8x128xf32> to vector<8x128xf32>
    %107 = vector.shape_cast %104 : vector<8x128xf32> to vector<1x8x128xf32>
    tpu.vector_store %arg9[%c1_77, %c0_78, %c0_79], %107 {strides = array<i32>} : memref<4x8x128xf32, #tpu.memory_space<vmem>>, vector<1x8x128xf32>,
    %108 = arith.mulf %27, %39 : vector<8x128xf32>
    %cst_80 = arith.constant 0.000000e+00 : f32
    %109 = vector.broadcast %cst_80 : f32 to vector<8x128xf32>
    %110 = arith.select %41, %108, %109 : vector<8x128xi1>, vector<8x128xf32>
    %c2_i32 = arith.constant 2 : i32
    %111 = vector.broadcast %c2_i32 : i32 to vector<8x128xi32>
    %112 = arith.cmpi eq, %4, %111 : vector<8x128xi32>
    %c2_81 = arith.constant 2 : index
    %c0_82 = arith.constant 0 : index
    %c0_83 = arith.constant 0 : index
    %113 = vector.load %arg8[%c2_81, %c0_82, %c0_83] : memref<4x8x128xf32, #tpu.memory_space<vmem>>, vector<1x8x128xf32>
    %114 = vector.shape_cast %113 : vector<1x8x128xf32> to vector<8x128xf32>
    %115 = vector.shape_cast %110 : vector<8x128xf32> to vector<1x8x128xf32>
    %cst_84 = arith.constant dense<0.000000e+00> : vector<8x128xf32>
    %116 = vector.multi_reduction <add>, %115, %cst_84 [0] : vector<1x8x128xf32> to vector<8x128xf32>
    %117 = arith.addf %114, %116 : vector<8x128xf32>
    %c2_85 = arith.constant 2 : index
    %c0_86 = arith.constant 0 : index
    %c0_87 = arith.constant 0 : index
    %118 = vector.load %arg8[%c2_85, %c0_86, %c0_87] : memref<4x8x128xf32, #tpu.memory_space<vmem>>, vector<1x8x128xf32>
    %119 = vector.shape_cast %118 : vector<1x8x128xf32> to vector<8x128xf32>
    %120 = vector.shape_cast %117 : vector<8x128xf32> to vector<1x8x128xf32>
    tpu.vector_store %arg8[%c2_85, %c0_86, %c0_87], %120 {strides = array<i32>} : memref<4x8x128xf32, #tpu.memory_space<vmem>>, vector<1x8x128xf32>,
    %c2_88 = arith.constant 2 : index
    %c0_89 = arith.constant 0 : index
    %c0_90 = arith.constant 0 : index
    %121 = vector.load %arg7[%c2_88, %c0_89, %c0_90] : memref<4x8x128xf32, #tpu.memory_space<vmem>>, vector<1x8x128xf32>
    %122 = vector.shape_cast %121 : vector<1x8x128xf32> to vector<8x128xf32>
    %cst_91 = arith.constant 0.000000e+00 : f32
    %123 = vector.broadcast %cst_91 : f32 to vector<8x128xf32>
    %124 = arith.select %112, %110, %123 : vector<8x128xi1>, vector<8x128xf32>
    %125 = vector.shape_cast %124 : vector<8x128xf32> to vector<1x8x128xf32>
    %cst_92 = arith.constant dense<0.000000e+00> : vector<8x128xf32>
    %126 = vector.multi_reduction <add>, %125, %cst_92 [0] : vector<1x8x128xf32> to vector<8x128xf32>
    %127 = arith.addf %122, %126 : vector<8x128xf32>
    %c2_93 = arith.constant 2 : index
    %c0_94 = arith.constant 0 : index
    %c0_95 = arith.constant 0 : index
    %128 = vector.load %arg7[%c2_93, %c0_94, %c0_95] : memref<4x8x128xf32, #tpu.memory_space<vmem>>, vector<1x8x128xf32>
    %129 = vector.shape_cast %128 : vector<1x8x128xf32> to vector<8x128xf32>
    %130 = vector.shape_cast %127 : vector<8x128xf32> to vector<1x8x128xf32>
    tpu.vector_store %arg7[%c2_93, %c0_94, %c0_95], %130 {strides = array<i32>} : memref<4x8x128xf32, #tpu.memory_space<vmem>>, vector<1x8x128xf32>,
    %c2_96 = arith.constant 2 : index
    %c0_97 = arith.constant 0 : index
    %c0_98 = arith.constant 0 : index
    %131 = vector.load %arg9[%c2_96, %c0_97, %c0_98] : memref<4x8x128xf32, #tpu.memory_space<vmem>>, vector<1x8x128xf32>
    %132 = vector.shape_cast %131 : vector<1x8x128xf32> to vector<8x128xf32>
    %133 = arith.extui %112 : vector<8x128xi1> to vector<8x128xi32>
    %134 = arith.sitofp %133 : vector<8x128xi32> to vector<8x128xf32>
    %135 = vector.shape_cast %134 : vector<8x128xf32> to vector<1x8x128xf32>
    %cst_99 = arith.constant dense<0.000000e+00> : vector<8x128xf32>
    %136 = vector.multi_reduction <add>, %135, %cst_99 [0] : vector<1x8x128xf32> to vector<8x128xf32>
    %137 = arith.addf %132, %136 : vector<8x128xf32>
    %c2_100 = arith.constant 2 : index
    %c0_101 = arith.constant 0 : index
    %c0_102 = arith.constant 0 : index
    %138 = vector.load %arg9[%c2_100, %c0_101, %c0_102] : memref<4x8x128xf32, #tpu.memory_space<vmem>>, vector<1x8x128xf32>
    %139 = vector.shape_cast %138 : vector<1x8x128xf32> to vector<8x128xf32>
    %140 = vector.shape_cast %137 : vector<8x128xf32> to vector<1x8x128xf32>
    tpu.vector_store %arg9[%c2_100, %c0_101, %c0_102], %140 {strides = array<i32>} : memref<4x8x128xf32, #tpu.memory_space<vmem>>, vector<1x8x128xf32>,
    %141 = arith.mulf %31, %39 : vector<8x128xf32>
    %cst_103 = arith.constant 0.000000e+00 : f32
    %142 = vector.broadcast %cst_103 : f32 to vector<8x128xf32>
    %143 = arith.select %41, %141, %142 : vector<8x128xi1>, vector<8x128xf32>
    %c3_i32 = arith.constant 3 : i32
    %144 = vector.broadcast %c3_i32 : i32 to vector<8x128xi32>
    %145 = arith.cmpi eq, %4, %144 : vector<8x128xi32>
    %c3_104 = arith.constant 3 : index
    %c0_105 = arith.constant 0 : index
    %c0_106 = arith.constant 0 : index
    %146 = vector.load %arg8[%c3_104, %c0_105, %c0_106] : memref<4x8x128xf32, #tpu.memory_space<vmem>>, vector<1x8x128xf32>
    %147 = vector.shape_cast %146 : vector<1x8x128xf32> to vector<8x128xf32>
    %148 = vector.shape_cast %143 : vector<8x128xf32> to vector<1x8x128xf32>
    %cst_107 = arith.constant dense<0.000000e+00> : vector<8x128xf32>
    %149 = vector.multi_reduction <add>, %148, %cst_107 [0] : vector<1x8x128xf32> to vector<8x128xf32>
    %150 = arith.addf %147, %149 : vector<8x128xf32>
    %c3_108 = arith.constant 3 : index
    %c0_109 = arith.constant 0 : index
    %c0_110 = arith.constant 0 : index
    %151 = vector.load %arg8[%c3_108, %c0_109, %c0_110] : memref<4x8x128xf32, #tpu.memory_space<vmem>>, vector<1x8x128xf32>
    %152 = vector.shape_cast %151 : vector<1x8x128xf32> to vector<8x128xf32>
    %153 = vector.shape_cast %150 : vector<8x128xf32> to vector<1x8x128xf32>
    tpu.vector_store %arg8[%c3_108, %c0_109, %c0_110], %153 {strides = array<i32>} : memref<4x8x128xf32, #tpu.memory_space<vmem>>, vector<1x8x128xf32>,
    %c3_111 = arith.constant 3 : index
    %c0_112 = arith.constant 0 : index
    %c0_113 = arith.constant 0 : index
    %154 = vector.load %arg7[%c3_111, %c0_112, %c0_113] : memref<4x8x128xf32, #tpu.memory_space<vmem>>, vector<1x8x128xf32>
    %155 = vector.shape_cast %154 : vector<1x8x128xf32> to vector<8x128xf32>
    %cst_114 = arith.constant 0.000000e+00 : f32
    %156 = vector.broadcast %cst_114 : f32 to vector<8x128xf32>
    %157 = arith.select %145, %143, %156 : vector<8x128xi1>, vector<8x128xf32>
    %158 = vector.shape_cast %157 : vector<8x128xf32> to vector<1x8x128xf32>
    %cst_115 = arith.constant dense<0.000000e+00> : vector<8x128xf32>
    %159 = vector.multi_reduction <add>, %158, %cst_115 [0] : vector<1x8x128xf32> to vector<8x128xf32>
    %160 = arith.addf %155, %159 : vector<8x128xf32>
    %c3_116 = arith.constant 3 : index
    %c0_117 = arith.constant 0 : index
    %c0_118 = arith.constant 0 : index
    %161 = vector.load %arg7[%c3_116, %c0_117, %c0_118] : memref<4x8x128xf32, #tpu.memory_space<vmem>>, vector<1x8x128xf32>
    %162 = vector.shape_cast %161 : vector<1x8x128xf32> to vector<8x128xf32>
    %163 = vector.shape_cast %160 : vector<8x128xf32> to vector<1x8x128xf32>
    tpu.vector_store %arg7[%c3_116, %c0_117, %c0_118], %163 {strides = array<i32>} : memref<4x8x128xf32, #tpu.memory_space<vmem>>, vector<1x8x128xf32>,
    %c3_119 = arith.constant 3 : index
    %c0_120 = arith.constant 0 : index
    %c0_121 = arith.constant 0 : index
    %164 = vector.load %arg9[%c3_119, %c0_120, %c0_121] : memref<4x8x128xf32, #tpu.memory_space<vmem>>, vector<1x8x128xf32>
    %165 = vector.shape_cast %164 : vector<1x8x128xf32> to vector<8x128xf32>
    %166 = arith.extui %145 : vector<8x128xi1> to vector<8x128xi32>
    %167 = arith.sitofp %166 : vector<8x128xi32> to vector<8x128xf32>
    %168 = vector.shape_cast %167 : vector<8x128xf32> to vector<1x8x128xf32>
    %cst_122 = arith.constant dense<0.000000e+00> : vector<8x128xf32>
    %169 = vector.multi_reduction <add>, %168, %cst_122 [0] : vector<1x8x128xf32> to vector<8x128xf32>
    %170 = arith.addf %165, %169 : vector<8x128xf32>
    %c3_123 = arith.constant 3 : index
    %c0_124 = arith.constant 0 : index
    %c0_125 = arith.constant 0 : index
    %171 = vector.load %arg9[%c3_123, %c0_124, %c0_125] : memref<4x8x128xf32, #tpu.memory_space<vmem>>, vector<1x8x128xf32>
    %172 = vector.shape_cast %171 : vector<1x8x128xf32> to vector<8x128xf32>
    %173 = vector.shape_cast %170 : vector<8x128xf32> to vector<1x8x128xf32>
    tpu.vector_store %arg9[%c3_123, %c0_124, %c0_125], %173 {strides = array<i32>} : memref<4x8x128xf32, #tpu.memory_space<vmem>>, vector<1x8x128xf32>,
    %c0_i32_126 = arith.constant 0 : i32
    %174 = arith.cmpi eq, %arg1, %c0_i32_126 : i32
    %175 = arith.extui %174 : i1 to i32
    %c0_i32_127 = arith.constant 0 : i32
    %176 = arith.cmpi ne, %175, %c0_i32_127 : i32
    scf.if %176 {
      %c0_128 = arith.constant 0 : index
      %c0_129 = arith.constant 0 : index
      %c0_130 = arith.constant 0 : index
      %177 = vector.load %arg7[%c0_128, %c0_129, %c0_130] : memref<4x8x128xf32, #tpu.memory_space<vmem>>, vector<4x8x128xf32>
      %cst_131 = arith.constant dense<0.000000e+00> : vector<4x128xf32>
      %178 = vector.multi_reduction <add>, %177, %cst_131 [1] : vector<4x8x128xf32> to vector<4x128xf32>
      %c0_132 = arith.constant 0 : index
      %c0_133 = arith.constant 0 : index
      %c0_134 = arith.constant 0 : index
      %179 = vector.load %arg4[%c0_132, %c0_133, %c0_134] : memref<1x4x128xf32, #tpu.memory_space<vmem>>, vector<1x4x128xf32>
      %180 = vector.shape_cast %179 : vector<1x4x128xf32> to vector<4x128xf32>
      %181 = vector.shape_cast %178 : vector<4x128xf32> to vector<1x4x128xf32>
      tpu.vector_store %arg4[%c0_132, %c0_133, %c0_134], %181 {strides = array<i32>} : memref<1x4x128xf32, #tpu.memory_space<vmem>>, vector<1x4x128xf32>,
      %c0_135 = arith.constant 0 : index
      %c0_136 = arith.constant 0 : index
      %c0_137 = arith.constant 0 : index
      %182 = vector.load %arg8[%c0_135, %c0_136, %c0_137] : memref<4x8x128xf32, #tpu.memory_space<vmem>>, vector<4x8x128xf32>
      %cst_138 = arith.constant dense<0.000000e+00> : vector<4x128xf32>
      %183 = vector.multi_reduction <add>, %182, %cst_138 [1] : vector<4x8x128xf32> to vector<4x128xf32>
      %c0_139 = arith.constant 0 : index
      %c0_140 = arith.constant 0 : index
      %c0_141 = arith.constant 0 : index
      %184 = vector.load %arg5[%c0_139, %c0_140, %c0_141] : memref<1x4x128xf32, #tpu.memory_space<vmem>>, vector<1x4x128xf32>
      %185 = vector.shape_cast %184 : vector<1x4x128xf32> to vector<4x128xf32>
      %186 = vector.shape_cast %183 : vector<4x128xf32> to vector<1x4x128xf32>
      tpu.vector_store %arg5[%c0_139, %c0_140, %c0_141], %186 {strides = array<i32>} : memref<1x4x128xf32, #tpu.memory_space<vmem>>, vector<1x4x128xf32>,
      %c0_142 = arith.constant 0 : index
      %c0_143 = arith.constant 0 : index
      %c0_144 = arith.constant 0 : index
      %187 = vector.load %arg9[%c0_142, %c0_143, %c0_144] : memref<4x8x128xf32, #tpu.memory_space<vmem>>, vector<4x8x128xf32>
      %cst_145 = arith.constant dense<0.000000e+00> : vector<4x128xf32>
      %188 = vector.multi_reduction <add>, %187, %cst_145 [1] : vector<4x8x128xf32> to vector<4x128xf32>
      %c0_146 = arith.constant 0 : index
      %c0_147 = arith.constant 0 : index
      %c0_148 = arith.constant 0 : index
      %189 = vector.load %arg6[%c0_146, %c0_147, %c0_148] : memref<1x4x128xf32, #tpu.memory_space<vmem>>, vector<1x4x128xf32>
      %190 = vector.shape_cast %189 : vector<1x4x128xf32> to vector<4x128xf32>
      %191 = vector.shape_cast %188 : vector<4x128xf32> to vector<1x4x128xf32>
      tpu.vector_store %arg6[%c0_146, %c0_147, %c0_148], %191 {strides = array<i32>} : memref<1x4x128xf32, #tpu.memory_space<vmem>>, vector<1x4x128xf32>,
    } else {
    }
    return
  }
  func.func @transform_0(%arg0: i32, %arg1: i32) -> (i32, i32, i32, i32) {
    %c0_i32 = arith.constant 0 : i32
    %c0_i32_0 = arith.constant 0 : i32
    %c0_i32_1 = arith.constant 0 : i32
    return %arg0, %c0_i32, %arg1, %c0_i32_0 : i32, i32, i32, i32
  }
  func.func @transform_1(%arg0: i32, %arg1: i32) -> (i32, i32, i32, i32) {
    %c0_i32 = arith.constant 0 : i32
    %c0_i32_0 = arith.constant 0 : i32
    %c0_i32_1 = arith.constant 0 : i32
    return %arg0, %c0_i32, %arg1, %c0_i32_0 : i32, i32, i32, i32
  }
  func.func @transform_2(%arg0: i32, %arg1: i32) -> (i32, i32, i32) {
    %c0_i32 = arith.constant 0 : i32
    %c0_i32_0 = arith.constant 0 : i32
    %c0_i32_1 = arith.constant 0 : i32
    return %arg0, %c0_i32, %c0_i32_0 : i32, i32, i32
  }
  func.func @transform_3(%arg0: i32, %arg1: i32) -> (i32, i32, i32) {
    %c0_i32 = arith.constant 0 : i32
    %c0_i32_0 = arith.constant 0 : i32
    %c0_i32_1 = arith.constant 0 : i32
    return %arg0, %c0_i32, %c0_i32_0 : i32, i32, i32
  }
  func.func @transform_4(%arg0: i32, %arg1: i32) -> (i32, i32, i32) {
    %c0_i32 = arith.constant 0 : i32
    %c0_i32_0 = arith.constant 0 : i32
    %c0_i32_1 = arith.constant 0 : i32
    return %arg0, %c0_i32, %c0_i32_0 : i32, i32, i32
  }
}

</mosaic_0001>

<bundles_post_ra>
// kernel: memory_efficient_soft_dice_loss.1
= control target key start
LH: loop header
LB: loop body
LE: loop exit
PB: predicated region body
PF: predicated region fallthrough
CT: control target
= control target key end

     0   :  { %s763_s15 = smov 0   ;;  %s765_s16 = smov 0   ;;  %s847_s0 = inlined_call_operand.vmem [shape: f32[2,4,8,128], index: 0, kind: input, shape index: {}]   ;;  %s848_s1 = inlined_call_operand.vmem [shape: s32[2,1,8,128], index: 1, kind: input, shape index: {}]   ;;  %s849_s2 = inlined_call_operand.vmem [shape: f32[2,4,128], index: 2, kind: output, shape index: {0}]   ;;  %s850_s3 = inlined_call_operand.vmem [shape: f32[2,4,128], index: 3, kind: output, shape index: {1}]   ;;  %s851_s4 = inlined_call_operand.vmem [shape: f32[2,4,128], index: 4, kind: output, shape index: {2}]  }
   0x1   :  { %s767_s17 = smov 0  }
   0x2 LB: > { %s27_s18 = sadd.s32 1, %s731_s16  ;;  %p661_p0 = scmp.ge.s32.totalorder %s735_s17, 1  ;;  %s735_s17 = sphi %s767_s17, %s15_s17   ;;  %s731_s16 = sphi %s765_s16, %s853_s16   ;;  %s727_s15 = sphi %s763_s15, %s852_s15  }
   0x3   : > { %p29_p1 = scmp.ge.s32.totalorder %s27_s18, 2  ;;  %p198_p2 = scmp.lt.s32.totalorder %s735_s17, 3 }
   0x5   : > { %s855_s18 = smov (%p29_p1, %s27_s18), 0  ;;  %p199_p3 = pnand %p661_p0, %p198_p2 }
   0x6   : > { %p241_p4 = scmp.lt.s32.totalorder (!%p199_p3), %s727_s15, 1 }
   0x7   : > { %202 = sbr.rel (%p199_p3) target bundleno = 89 (0x59), region = 28 }
   0xc   : > { %s857_s15 = smov (!%p241_p4, %s727_s15), 1  ;;  %v737_v6 = vmov 0.0   ;;  %vm431_vm4 = vcmask 1041409   ;;  %vm433_vm5 = vcmask 1042434   ;;  %vm435_vm6 = vcmask 1043459  }
   0xd   : > { %s677_s19 = sshll.u32 %s857_s15, 5  ;;  %s664_s20 = sshll.u32 %s857_s15, 3 }
   0xe   : > { %s248_s23 = scalar_lea.vmem %s847_s0, %s677_s19  ;;  %s255_s26 = scalar_lea.vmem %s848_s1, %s664_s20 }
   0xf   : > { %v791_v0 = vld [vmem:[%s255_s26] sm:$0xff]  ;;  %v668_v2 = vld [vmem:[%s248_s23 + $0x8] sm:$0xff]  ;;  %v669_v4 = vld [vmem:[%s248_s23 + $0x10] sm:$0xff]  ;;  %s806_s27 = sshll.u32 %s857_s15, 2 }
  0x10   : > { %v285_v1 = vld [vmem:[%s248_s23] sm:$0xff]  ;;  %vm317_vm0 = vcmp.eq.s32.totalorder %v791_v0, 0  ;;  %vm335_vm1 = vcmp.eq.s32.totalorder %v791_v0, 1  ;;  %v670_v5 = vld [vmem:[%s248_s23 + $0x18] sm:$0xff]  ;;  %vm356_vm2 = vcmp.eq.s32.totalorder %v791_v0, 2  ;;  %vm377_vm3 = vcmp.eq.s32.totalorder %v791_v0, 3  ;;  %s267_s30 = scalar_lea.vmem %s851_s4, %s806_s27  ;;  %s259_s7 = scalar_lea.vmem %s849_s2, %s806_s27 }
  0x11   : > { %v288_v3 = vmax.f32 %v285_v1, %v668_v2  ;;  %v671_v7 = vsel %vm317_vm0, 1.0, %v737_v6  ;;  %v672_v8 = vsel %vm335_vm1, 1.0, %v737_v6  ;;  %v673_v10 = vsel %vm356_vm2, 1.0, %v737_v6  ;;  %s263_s10 = scalar_lea.vmem %s850_s3, %s806_s27 }
  0x12   : > { %v674_v11 = vsel %vm377_vm3, 1.0, %v737_v6  ;;  %v480_v12 = vrot.slane %v671_v7, 4  ;;  %v486_v13 = vrot.slane %v672_v8, 4  ;;  %v492_v14 = vrot.slane %v673_v10, 4 }
  0x13   : > { %v291_v9 = vmax.f32 %v288_v3, %v669_v4  ;;  %v498_v15 = vrot.slane %v674_v11, 4  ;;  %vm314_vm7 = vcmp.lt.s32.totalorder %v791_v0, 4 }
  0x14   : > { %v481_v17 = vadd.f32 %v671_v7, %v480_v12  ;;  %v487_v18 = vadd.f32 %v672_v8, %v486_v13  ;;  %v493_v19 = vadd.f32 %v673_v10, %v492_v14 }
  0x15   : > { %v294_v16 = vmax.f32 %v291_v9, %v670_v5  ;;  %v499_v20 = vadd.f32 %v674_v11, %v498_v15 }
  0x16   : > { %v482_v25 = vrot.slane %v481_v17, 2  ;;  %v488_v26 = vrot.slane %v487_v18, 2  ;;  %v494_v27 = vrot.slane %v493_v19, 2 }
  0x17   : > { %v295_v21 = vsub.f32 %v285_v1, %v294_v16  ;;  %v298_v22 = vsub.f32 %v668_v2, %v294_v16  ;;  %v301_v23 = vsub.f32 %v669_v4, %v294_v16  ;;  %v304_v24 = vsub.f32 %v670_v5, %v294_v16 }
  0x18   : > { %v500_v28 = vrot.slane %v499_v20, 2  ;;  %v483_v33 = vadd.f32 %v482_v25, %v481_v17  ;;  %v489_v34 = vadd.f32 %v488_v26, %v487_v18  ;;  %v495_v35 = vadd.f32 %v494_v27, %v493_v19 }
  0x19   : > { %v296_v29 = vmul.f32 1.442695, %v295_v21  ;;  %v299_v30 = vmul.f32 1.442695, %v298_v22  ;;  %v302_v31 = vmul.f32 1.442695, %v301_v23 }
  0x1a   : > { %v305_v32 = vmul.f32 1.442695, %v304_v24  ;;  %v501_v36 = vadd.f32 %v500_v28, %v499_v20  ;;  %v484_v37 = vrot.slane %v483_v33, 1  ;;  %v490_v38 = vrot.slane %v489_v34, 1 }
  0x1b   : > { %703 = vpow2.f32 %v296_v29  ;;  %v496_v39 = vrot.slane %v495_v35, 1 }
  0x1c   : > { %705 = vpow2.f32 %v299_v30  ;;  %v502_v40 = vrot.slane %v501_v36, 1  ;;  %v485_v41 = vadd.f32 %v484_v37, %v483_v33  ;;  %v491_v42 = vadd.f32 %v490_v38, %v489_v34 }
  0x1d   : > { %707 = vpow2.f32 %v302_v31  ;;  %v497_v43 = vadd.f32 %v496_v39, %v495_v35 }
  0x1e   : > { %709 = vpow2.f32 %v305_v32  ;;  %v503_v44 = vadd.f32 %v502_v40, %v501_v36  ;;  %v508_v45 = vsel %vm431_vm4, %v491_v42, %v485_v41 }
  0x1f   : > { %v509_v46 = vsel %vm433_vm5, %v497_v43, %v508_v45 }
  0x20   : > { %v510_v47 = vsel %vm435_vm6, %v503_v44, %v509_v46 }
  0x21   : > { %512 = vst [vmem:[%s267_s30] sm:$0xf] %v510_v47 }
  0x28   : > { %v704_v48 = vpop.eup %703 }
  0x29   : > { %v706_v49 = vpop.eup %705 }
  0x2a   : > { %v708_v50 = vpop.eup %707  ;;  %v307_v51 = vadd.f32 %v706_v49, %v704_v48 }
  0x2b   : > { %v710_v52 = vpop.eup %709 }
  0x2c   : > { %v308_v53 = vadd.f32 %v708_v50, %v307_v51 }
  0x2e   : > { %v309_v54 = vadd.f32 %v710_v52, %v308_v53 }
  0x30   : > { %711 = vrcp.f32 %v309_v54 }
  0x3d   : > { %v712_v55 = vpop.eup %711 }
  0x3e   : > { %v311_v56 = vmul.f32 %v712_v55, %v309_v54 }
  0x40   : > { %v312_v57 = vsub.f32 2.0, %v311_v56 }
  0x42   : > { %v313_v58 = vmul.f32 %v712_v55, %v312_v57 }
  0x44   : > { %v315_v59 = vmul.f32 %v704_v48, %v313_v58  ;;  %v333_v60 = vmul.f32 %v706_v49, %v313_v58  ;;  %v354_v61 = vmul.f32 %v708_v50, %v313_v58  ;;  %v375_v62 = vmul.f32 %v710_v52, %v313_v58 }
  0x46   : > { %v316_v63 = vsel %vm314_vm7, %v315_v59, 0.0  ;;  %v334_v1 = vsel %vm314_vm7, %v333_v60, 0.0  ;;  %v355_v2 = vsel %vm314_vm7, %v354_v61, 0.0  ;;  %v376_v3 = vsel %vm314_vm7, %v375_v62, 0.0 }
  0x47   : > { %v323_v4 = vsel %vm317_vm0, %v316_v63, 0.0  ;;  %v343_v5 = vsel %vm335_vm1, %v334_v1, 0.0  ;;  %v364_v6 = vsel %vm356_vm2, %v355_v2, 0.0  ;;  %v385_v7 = vsel %vm377_vm3, %v376_v3, 0.0 }
  0x48   : > { %v403_v8 = vrot.slane %v323_v4, 4  ;;  %v409_v9 = vrot.slane %v343_v5, 4  ;;  %v415_v10 = vrot.slane %v364_v6, 4  ;;  %v421_v11 = vrot.slane %v385_v7, 4 }
  0x49   : > { %v443_v12 = vrot.slane %v316_v63, 4  ;;  %v449_v13 = vrot.slane %v334_v1, 4  ;;  %v455_v14 = vrot.slane %v355_v2, 4  ;;  %v461_v15 = vrot.slane %v376_v3, 4 }
  0x4a   : > { %v404_v16 = vadd.f32 %v403_v8, %v323_v4  ;;  %v410_v17 = vadd.f32 %v409_v9, %v343_v5  ;;  %v416_v18 = vadd.f32 %v415_v10, %v364_v6  ;;  %v422_v19 = vadd.f32 %v421_v11, %v385_v7 }
  0x4b   : > { %v444_v20 = vadd.f32 %v443_v12, %v316_v63  ;;  %v450_v21 = vadd.f32 %v449_v13, %v334_v1  ;;  %v456_v22 = vadd.f32 %v455_v14, %v355_v2  ;;  %v462_v23 = vadd.f32 %v461_v15, %v376_v3 }
  0x4c   : > { %v405_v24 = vrot.slane %v404_v16, 2  ;;  %v411_v25 = vrot.slane %v410_v17, 2  ;;  %v417_v0 = vrot.slane %v416_v18, 2  ;;  %v423_v26 = vrot.slane %v422_v19, 2 }
  0x4d   : > { %v445_v27 = vrot.slane %v444_v20, 2  ;;  %v451_v28 = vrot.slane %v450_v21, 2  ;;  %v457_v29 = vrot.slane %v456_v22, 2  ;;  %v463_v30 = vrot.slane %v462_v23, 2 }
  0x4e   : > { %v406_v31 = vadd.f32 %v405_v24, %v404_v16  ;;  %v412_v32 = vadd.f32 %v411_v25, %v410_v17  ;;  %v418_v33 = vadd.f32 %v417_v0, %v416_v18  ;;  %v424_v34 = vadd.f32 %v423_v26, %v422_v19 }
  0x4f   : > { %v446_v35 = vadd.f32 %v445_v27, %v444_v20  ;;  %v452_v36 = vadd.f32 %v451_v28, %v450_v21  ;;  %v458_v37 = vadd.f32 %v457_v29, %v456_v22  ;;  %v464_v38 = vadd.f32 %v463_v30, %v462_v23 }
  0x50   : > { %v407_v39 = vrot.slane %v406_v31, 1  ;;  %v413_v40 = vrot.slane %v412_v32, 1  ;;  %v419_v41 = vrot.slane %v418_v33, 1  ;;  %v425_v42 = vrot.slane %v424_v34, 1 }
  0x51   : > { %v447_v43 = vrot.slane %v446_v35, 1  ;;  %v453_v44 = vrot.slane %v452_v36, 1  ;;  %v459_v45 = vrot.slane %v458_v37, 1  ;;  %v465_v46 = vrot.slane %v464_v38, 1 }
  0x52   : > { %v408_v47 = vadd.f32 %v407_v39, %v406_v31  ;;  %v414_v48 = vadd.f32 %v413_v40, %v412_v32  ;;  %v420_v49 = vadd.f32 %v419_v41, %v418_v33  ;;  %v426_v50 = vadd.f32 %v425_v42, %v424_v34 }
  0x53   : > { %v448_v51 = vadd.f32 %v447_v43, %v446_v35  ;;  %v454_v52 = vadd.f32 %v453_v44, %v452_v36  ;;  %v460_v53 = vadd.f32 %v459_v45, %v458_v37  ;;  %v466_v54 = vadd.f32 %v465_v46, %v464_v38 }
  0x54   : > { %v432_v55 = vsel %vm431_vm4, %v414_v48, %v408_v47 }
  0x55   : > { %v434_v56 = vsel %vm433_vm5, %v420_v49, %v432_v55  ;;  %v471_v57 = vsel %vm431_vm4, %v454_v52, %v448_v51 }
  0x56   : > { %v436_v58 = vsel %vm435_vm6, %v426_v50, %v434_v56  ;;  %v472_v59 = vsel %vm433_vm5, %v460_v53, %v471_v57 }
  0x57   : > { %438 = vst [vmem:[%s259_s7] sm:$0xf] %v436_v58  ;;  %v473_v60 = vsel %vm435_vm6, %v466_v54, %v472_v59 }
  0x58   : > { %475 = vst [vmem:[%s263_s10] sm:$0xf] %v473_v60 }
  0x59 PF: > { %s15_s17 = sadd.s32 1, %s735_s17   ;;  %s852_s15 = smov %s731_s16 }
  0x5a   : > { %p12_p5 = scmp.ge.s32.totalorder %s15_s17, 4   ;;  %s853_s16 = smov %s855_s18 }
  0x5c   :  { %14 = sbr.rel (!%p12_p5) target bundleno = 2 (0x2), region = 105 }

</bundles_post_ra>
